<compile_context>
chip_gen: v6e
topology: v6e:2x2x1
jax: 0.10.0
libtpu: 0.0.40
codegen_flags: <defaults>
</compile_context>

<pallas_src>
from functools import partial

import jax
import jax.numpy as jnp
from jax.experimental import pallas as pl
from jax.experimental.pallas import tpu as pltpu


def _rbp_render_kernel(o_ref, t_ref, tex_ref, out_ref, *,
                       num_samples, tex_h, tex_w, channels):
    # clamp(self.Texture, 0, 1) -- done in-kernel on the (C*H, W) texture slab.
    tex = jnp.clip(tex_ref[...], 0.0, 1.0).astype(jnp.bfloat16)      # (C*H, W)

    o = o_ref[...]                                                    # (8, TN) rows 0..2 = xyz
    d = t_ref[...] - o                                                # ray directions
    tn = o.shape[1]

    # Texel-centre coordinate grids, generated in-kernel (no HBM inputs).
    iu = jax.lax.broadcasted_iota(jnp.int32, (tex_w, tn), 0).astype(jnp.float32)
    iv = jax.lax.broadcasted_iota(jnp.int32, (tex_h, tn), 0).astype(jnp.float32)

    inv_s = 1.0 / float(num_samples)
    acc = jnp.zeros((channels, tn), dtype=jnp.float32)

    # Static unroll over the (small) number of samples along each ray.
    for s in range(num_samples):
        t = (s + 0.5) * inv_s
        pt = o + t * d                                                # (8, TN)
        u = jnp.clip(pt[0:1, :], 0.0, 1.0) * float(tex_w - 1)         # (1, TN)
        v = jnp.clip(pt[1:2, :], 0.0, 1.0) * float(tex_h - 1)         # (1, TN)

        # Separable bilinear "tent" weights, lane-dense over rays.
        wu = jnp.maximum(1.0 - jnp.abs(iu - u), 0.0)                  # (W, TN)
        wv = jnp.maximum(1.0 - jnp.abs(iv - v), 0.0)                  # (H, TN)

        # MXU: contract the texture W axis against wu -> (C*H, TN).
        m = jnp.dot(tex, wu.astype(jnp.bfloat16),
                    preferred_element_type=jnp.float32)               # (C*H, TN)

        # VPU/XLU: per-channel reduction of the H axis against wv.
        rows = []
        for c in range(channels):
            blk = m[c * tex_h:(c + 1) * tex_h, :]                     # (H, TN)
            rows.append(jnp.sum(wv * blk, axis=0, keepdims=True))     # (1, TN)
        acc = acc + jnp.concatenate(rows, axis=0)                     # (C, TN)

    # Average over samples once (scaling hoisted out of the loop); single
    # lane-dense (C, TN) store.
    out_ref[...] = acc * inv_s


def rbp_render(origins, targets, texture, output_dim, number_of_samples, *,
               tile_n=256):
    assert tile_n % 128 == 0
    out_h, out_w = output_dim
    n = origins.shape[0]
    tex_h, tex_w, c = texture.shape

    # Lane-dense ray layout: (N, 3) -> (8, N_pad) with rays on the lane axis
    # (xyz in sublane rows 0..2, padded to 8 sublanes / tile_n lanes).
    n_pad = -(-n // tile_n) * tile_n

    def to_lane_major(a):
        a = jnp.asarray(a, jnp.float32).T                             # (3, N)
        return jnp.pad(a, ((0, 8 - a.shape[0]), (0, n_pad - n)))       # (8, N_pad)

    o_l = to_lane_major(origins)
    t_l = to_lane_major(targets)

    # Texture rearranged so the MXU contraction is the W axis and output rows
    # are (channel, row): (H, W, C) -> (C*H, W).  The clamp stays in-kernel.
    tex_cw = jnp.transpose(jnp.asarray(texture, jnp.float32),
                           (2, 0, 1)).reshape(c * tex_h, tex_w)

    kernel = partial(_rbp_render_kernel, num_samples=number_of_samples,
                     tex_h=tex_h, tex_w=tex_w, channels=c)

    out_t = pl.pallas_call(
        kernel,
        out_shape=jax.ShapeDtypeStruct((c, n_pad), jnp.float32),
        grid=(n_pad // tile_n,),
        in_specs=[
            pl.BlockSpec((8, tile_n), lambda i: (0, i)),              # origins (xyz rows)
            pl.BlockSpec((8, tile_n), lambda i: (0, i)),              # targets
            pl.BlockSpec((c * tex_h, tex_w), lambda i: (0, 0)),       # texture, resident
        ],
        out_specs=pl.BlockSpec((c, tile_n), lambda i: (0, i)),
        compiler_params=pltpu.CompilerParams(
            dimension_semantics=("parallel",),          # v7x: 2 TCs split ray tiles
            vmem_limit_bytes=48 * 1024 * 1024,          # fits v7x 64 MiB VMEM
        ),
    )(o_l, t_l, tex_cw)

    # (C, N_pad) -> (H_out, W_out, C); pure layout plumbing in the wrapper.
    return out_t[:, :n].T.reshape(out_h, out_w, c)


def rbp_render_ref(origins, targets, texture, output_dim, number_of_samples):
    """Pure-JAX reference of the same sampling scheme (f32 throughout)."""
    out_h, out_w = output_dim
    tex = jnp.clip(jnp.asarray(texture, jnp.float32), 0.0, 1.0)
    tex_h, tex_w, c = tex.shape
    o = jnp.asarray(origins, jnp.float32)
    d = jnp.asarray(targets, jnp.float32) - o
    s = (jnp.arange(number_of_samples, dtype=jnp.float32) + 0.5) / number_of_samples
    pts = o[None, :, :] + s[:, None, None] * d[None, :, :]            # (S, N, 3)
    u = jnp.clip(pts[..., 0], 0.0, 1.0) * (tex_w - 1)                 # (S, N)
    v = jnp.clip(pts[..., 1], 0.0, 1.0) * (tex_h - 1)                 # (S, N)
    ju = jnp.arange(tex_w, dtype=jnp.float32)
    iv = jnp.arange(tex_h, dtype=jnp.float32)
    wu = jnp.maximum(1.0 - jnp.abs(ju[None, None, :] - u[..., None]), 0.0)  # (S,N,W)
    wv = jnp.maximum(1.0 - jnp.abs(iv[None, None, :] - v[..., None]), 0.0)  # (S,N,H)
    img = jnp.einsum('snh,snw,hwc->nc', wv, wu, tex) / number_of_samples
    return img.reshape(out_h, out_w, c)


class TrainableTexture:
    """JAX port of the PyTorch TrainableTexture module (forward pass only)."""

    def __init__(self, texture, output_dim, number_of_samples):
        self.texture_dim = texture.shape
        self.Texture = texture                      # trainable parameter
        self.output_dim = output_dim
        self.number_of_samples = number_of_samples

    def forward(self, origins, targets):
        # renderer(origins, targets, clamp(Texture, 0, 1)); clamp is in-kernel.
        return rbp_render(origins, targets, self.Texture,
                          self.output_dim, self.number_of_samples)


if __name__ == "__main__":
    key = jax.random.PRNGKey(0)
    k_tex, k_jit = jax.random.split(key)

    # Small deterministic setup: 16x16 RGB texture, 8x8 output, 4 samples/ray.
    tex_h, tex_w, c = 16, 16, 3
    out_h, out_w = 8, 8
    number_of_samples = 4

    texture = jax.random.uniform(k_tex, (tex_h, tex_w, c),
                                 dtype=jnp.float32, minval=-0.25, maxval=1.25)

    # Rays: one per output pixel, origins above the texture plane, targets on it.
    ys, xs = jnp.meshgrid(
        (jnp.arange(out_h, dtype=jnp.float32) + 0.5) / out_h,
        (jnp.arange(out_w, dtype=jnp.float32) + 0.5) / out_w,
        indexing="ij")
    n = out_h * out_w
    origins = jnp.stack(
        [xs.reshape(n), ys.reshape(n), jnp.ones((n,), jnp.float32)], axis=-1)
    jitter = 0.05 * jax.random.uniform(k_jit, (n, 2), dtype=jnp.float32,
                                       minval=-1.0, maxval=1.0)
    targets = jnp.stack(
        [xs.reshape(n) + jitter[:, 0], ys.reshape(n) + jitter[:, 1],
         jnp.zeros((n,), jnp.float32)], axis=-1)

    model = TrainableTexture(texture, (out_h, out_w), number_of_samples)
    img = model.forward(origins, targets)
    jax.block_until_ready(img)

    assert img.shape == (out_h, out_w, c), img.shape
    assert jnp.all(jnp.isfinite(img))

    # Validate against the pure-JAX reference of the same sampling scheme
    # (loose tolerance: MXU operands are bf16, accumulation is f32).
    ref = rbp_render_ref(origins, targets, texture, (out_h, out_w),
                         number_of_samples)
    max_err = float(jnp.max(jnp.abs(img - ref)))
    assert max_err < 5e-2, max_err

    print("KERNEL_OK")
</pallas_src>

<mosaic_0001>
module attributes {stable_mosaic.version = 11 : i64} {
  func.func @_rbp_render_kernel(%arg0: i32, %arg1: memref<8x256xf32, #tpu.memory_space<vmem>>, %arg2: memref<8x256xf32, #tpu.memory_space<vmem>>, %arg3: memref<48x16xf32, #tpu.memory_space<vmem>>, %arg4: memref<3x256xf32, #tpu.memory_space<vmem>>) attributes {dimension_semantics = [#tpu.dimension_semantics<parallel>], iteration_bounds = array<i64: 1>, scalar_prefetch = 0 : i64, scratch_operands = 0 : i64, tpu.core_type = #tpu.core_type<tc>, window_params = [{transform_indices = @transform_0, window_bounds = array<i64: 8, 256>}, {transform_indices = @transform_1, window_bounds = array<i64: 8, 256>}, {pipeline_mode = #tpu.pipeline_mode<synchronous>, transform_indices = @transform_2, window_bounds = array<i64: 48, 16>}, {transform_indices = @transform_3, window_bounds = array<i64: 3, 256>}]} {
    %c0 = arith.constant 0 : index
    %c0_0 = arith.constant 0 : index
    %0 = vector.load %arg3[%c0, %c0_0] : memref<48x16xf32, #tpu.memory_space<vmem>>, vector<48x16xf32>
    %cst = arith.constant 0.000000e+00 : f32
    %cst_1 = arith.constant 1.000000e+00 : f32
    %1 = vector.broadcast %cst : f32 to vector<48x16xf32>
    %2 = arith.maximumf %1, %0 : vector<48x16xf32>
    %3 = vector.broadcast %cst_1 : f32 to vector<48x16xf32>
    %4 = arith.minimumf %3, %2 : vector<48x16xf32>
    %5 = arith.truncf %4 : vector<48x16xf32> to vector<48x16xbf16>
    %c0_2 = arith.constant 0 : index
    %c0_3 = arith.constant 0 : index
    %6 = vector.load %arg1[%c0_2, %c0_3] : memref<8x256xf32, #tpu.memory_space<vmem>>, vector<8x256xf32>
    %c0_4 = arith.constant 0 : index
    %c0_5 = arith.constant 0 : index
    %7 = vector.load %arg2[%c0_4, %c0_5] : memref<8x256xf32, #tpu.memory_space<vmem>>, vector<8x256xf32>
    %8 = arith.subf %7, %6 : vector<8x256xf32>
    %9 = tpu.iota {dimensions = array<i32: 0>} : vector<16x256xi32>
    %10 = arith.sitofp %9 : vector<16x256xi32> to vector<16x256xf32>
    %11 = tpu.iota {dimensions = array<i32: 0>} : vector<16x256xi32>
    %12 = arith.sitofp %11 : vector<16x256xi32> to vector<16x256xf32>
    %cst_6 = arith.constant 0.000000e+00 : f32
    %13 = vector.broadcast %cst_6 : f32 to vector<3x256xf32>
    %cst_7 = arith.constant 1.250000e-01 : f32
    %14 = vector.broadcast %cst_7 : f32 to vector<8x256xf32>
    %15 = arith.mulf %14, %8 : vector<8x256xf32>
    %16 = arith.addf %6, %15 : vector<8x256xf32>
    %17 = vector.extract_strided_slice %16 {offsets = [0, 0], sizes = [1, 256], strides = [1, 1]} : vector<8x256xf32> to vector<1x256xf32>
    %cst_8 = arith.constant 0.000000e+00 : f32
    %cst_9 = arith.constant 1.000000e+00 : f32
    %18 = vector.broadcast %cst_8 : f32 to vector<1x256xf32>
    %19 = arith.maximumf %18, %17 : vector<1x256xf32>
    %20 = vector.broadcast %cst_9 : f32 to vector<1x256xf32>
    %21 = arith.minimumf %20, %19 : vector<1x256xf32>
    %cst_10 = arith.constant 1.500000e+01 : f32
    %22 = vector.broadcast %cst_10 : f32 to vector<1x256xf32>
    %23 = arith.mulf %21, %22 : vector<1x256xf32>
    %24 = vector.extract_strided_slice %16 {offsets = [1, 0], sizes = [1, 256], strides = [1, 1]} : vector<8x256xf32> to vector<1x256xf32>
    %cst_11 = arith.constant 0.000000e+00 : f32
    %cst_12 = arith.constant 1.000000e+00 : f32
    %25 = vector.broadcast %cst_11 : f32 to vector<1x256xf32>
    %26 = arith.maximumf %25, %24 : vector<1x256xf32>
    %27 = vector.broadcast %cst_12 : f32 to vector<1x256xf32>
    %28 = arith.minimumf %27, %26 : vector<1x256xf32>
    %cst_13 = arith.constant 1.500000e+01 : f32
    %29 = vector.broadcast %cst_13 : f32 to vector<1x256xf32>
    %30 = arith.mulf %28, %29 : vector<1x256xf32>
    %31 = vector.broadcast %23 : vector<1x256xf32> to vector<16x256xf32>
    %32 = arith.subf %10, %31 : vector<16x256xf32>
    %33 = math.absf %32 : vector<16x256xf32>
    %cst_14 = arith.constant 1.000000e+00 : f32
    %34 = vector.broadcast %cst_14 : f32 to vector<16x256xf32>
    %35 = arith.subf %34, %33 : vector<16x256xf32>
    %cst_15 = arith.constant 0.000000e+00 : f32
    %36 = vector.broadcast %cst_15 : f32 to vector<16x256xf32>
    %37 = arith.maximumf %35, %36 : vector<16x256xf32>
    %38 = vector.broadcast %30 : vector<1x256xf32> to vector<16x256xf32>
    %39 = arith.subf %12, %38 : vector<16x256xf32>
    %40 = math.absf %39 : vector<16x256xf32>
    %cst_16 = arith.constant 1.000000e+00 : f32
    %41 = vector.broadcast %cst_16 : f32 to vector<16x256xf32>
    %42 = arith.subf %41, %40 : vector<16x256xf32>
    %cst_17 = arith.constant 0.000000e+00 : f32
    %43 = vector.broadcast %cst_17 : f32 to vector<16x256xf32>
    %44 = arith.maximumf %42, %43 : vector<16x256xf32>
    %45 = arith.truncf %37 : vector<16x256xf32> to vector<16x256xbf16>
    %cst_18 = arith.constant dense<0.000000e+00> : vector<48x256xf32>
    %46 = tpu.matmul %5, %45, %cst_18 {dimension_numbers = #tpu.dot_dimension_numbers<[1], [0], [0], [1], [0, 0, 1, 1], [], []>} : vector<48x16xbf16>, vector<16x256xbf16>, vector<48x256xf32> -> vector<48x256xf32>
    %47 = vector.extract_strided_slice %46 {offsets = [0, 0], sizes = [16, 256], strides = [1, 1]} : vector<48x256xf32> to vector<16x256xf32>
    %48 = arith.mulf %44, %47 : vector<16x256xf32>
    %cst_19 = arith.constant dense<0.000000e+00> : vector<256xf32>
    %49 = vector.multi_reduction <add>, %48, %cst_19 [0] : vector<16x256xf32> to vector<256xf32>
    %50 = vector.shape_cast %49 : vector<256xf32> to vector<1x256xf32>
    %51 = vector.extract_strided_slice %46 {offsets = [16, 0], sizes = [16, 256], strides = [1, 1]} : vector<48x256xf32> to vector<16x256xf32>
    %52 = arith.mulf %44, %51 : vector<16x256xf32>
    %cst_20 = arith.constant dense<0.000000e+00> : vector<256xf32>
    %53 = vector.multi_reduction <add>, %52, %cst_20 [0] : vector<16x256xf32> to vector<256xf32>
    %54 = vector.shape_cast %53 : vector<256xf32> to vector<1x256xf32>
    %55 = vector.extract_strided_slice %46 {offsets = [32, 0], sizes = [16, 256], strides = [1, 1]} : vector<48x256xf32> to vector<16x256xf32>
    %56 = arith.mulf %44, %55 : vector<16x256xf32>
    %cst_21 = arith.constant dense<0.000000e+00> : vector<256xf32>
    %57 = vector.multi_reduction <add>, %56, %cst_21 [0] : vector<16x256xf32> to vector<256xf32>
    %58 = vector.shape_cast %57 : vector<256xf32> to vector<1x256xf32>
    %59 = tpu.concatenate %50, %54, %58 in 0 : vector<1x256xf32>, vector<1x256xf32>, vector<1x256xf32> -> vector<3x256xf32>
    %60 = arith.addf %13, %59 : vector<3x256xf32>
    %cst_22 = arith.constant 3.750000e-01 : f32
    %61 = vector.broadcast %cst_22 : f32 to vector<8x256xf32>
    %62 = arith.mulf %61, %8 : vector<8x256xf32>
    %63 = arith.addf %6, %62 : vector<8x256xf32>
    %64 = vector.extract_strided_slice %63 {offsets = [0, 0], sizes = [1, 256], strides = [1, 1]} : vector<8x256xf32> to vector<1x256xf32>
    %cst_23 = arith.constant 0.000000e+00 : f32
    %cst_24 = arith.constant 1.000000e+00 : f32
    %65 = vector.broadcast %cst_23 : f32 to vector<1x256xf32>
    %66 = arith.maximumf %65, %64 : vector<1x256xf32>
    %67 = vector.broadcast %cst_24 : f32 to vector<1x256xf32>
    %68 = arith.minimumf %67, %66 : vector<1x256xf32>
    %cst_25 = arith.constant 1.500000e+01 : f32
    %69 = vector.broadcast %cst_25 : f32 to vector<1x256xf32>
    %70 = arith.mulf %68, %69 : vector<1x256xf32>
    %71 = vector.extract_strided_slice %63 {offsets = [1, 0], sizes = [1, 256], strides = [1, 1]} : vector<8x256xf32> to vector<1x256xf32>
    %cst_26 = arith.constant 0.000000e+00 : f32
    %cst_27 = arith.constant 1.000000e+00 : f32
    %72 = vector.broadcast %cst_26 : f32 to vector<1x256xf32>
    %73 = arith.maximumf %72, %71 : vector<1x256xf32>
    %74 = vector.broadcast %cst_27 : f32 to vector<1x256xf32>
    %75 = arith.minimumf %74, %73 : vector<1x256xf32>
    %cst_28 = arith.constant 1.500000e+01 : f32
    %76 = vector.broadcast %cst_28 : f32 to vector<1x256xf32>
    %77 = arith.mulf %75, %76 : vector<1x256xf32>
    %78 = vector.broadcast %70 : vector<1x256xf32> to vector<16x256xf32>
    %79 = arith.subf %10, %78 : vector<16x256xf32>
    %80 = math.absf %79 : vector<16x256xf32>
    %cst_29 = arith.constant 1.000000e+00 : f32
    %81 = vector.broadcast %cst_29 : f32 to vector<16x256xf32>
    %82 = arith.subf %81, %80 : vector<16x256xf32>
    %cst_30 = arith.constant 0.000000e+00 : f32
    %83 = vector.broadcast %cst_30 : f32 to vector<16x256xf32>
    %84 = arith.maximumf %82, %83 : vector<16x256xf32>
    %85 = vector.broadcast %77 : vector<1x256xf32> to vector<16x256xf32>
    %86 = arith.subf %12, %85 : vector<16x256xf32>
    %87 = math.absf %86 : vector<16x256xf32>
    %cst_31 = arith.constant 1.000000e+00 : f32
    %88 = vector.broadcast %cst_31 : f32 to vector<16x256xf32>
    %89 = arith.subf %88, %87 : vector<16x256xf32>
    %cst_32 = arith.constant 0.000000e+00 : f32
    %90 = vector.broadcast %cst_32 : f32 to vector<16x256xf32>
    %91 = arith.maximumf %89, %90 : vector<16x256xf32>
    %92 = arith.truncf %84 : vector<16x256xf32> to vector<16x256xbf16>
    %cst_33 = arith.constant dense<0.000000e+00> : vector<48x256xf32>
    %93 = tpu.matmul %5, %92, %cst_33 {dimension_numbers = #tpu.dot_dimension_numbers<[1], [0], [0], [1], [0, 0, 1, 1], [], []>} : vector<48x16xbf16>, vector<16x256xbf16>, vector<48x256xf32> -> vector<48x256xf32>
    %94 = vector.extract_strided_slice %93 {offsets = [0, 0], sizes = [16, 256], strides = [1, 1]} : vector<48x256xf32> to vector<16x256xf32>
    %95 = arith.mulf %91, %94 : vector<16x256xf32>
    %cst_34 = arith.constant dense<0.000000e+00> : vector<256xf32>
    %96 = vector.multi_reduction <add>, %95, %cst_34 [0] : vector<16x256xf32> to vector<256xf32>
    %97 = vector.shape_cast %96 : vector<256xf32> to vector<1x256xf32>
    %98 = vector.extract_strided_slice %93 {offsets = [16, 0], sizes = [16, 256], strides = [1, 1]} : vector<48x256xf32> to vector<16x256xf32>
    %99 = arith.mulf %91, %98 : vector<16x256xf32>
    %cst_35 = arith.constant dense<0.000000e+00> : vector<256xf32>
    %100 = vector.multi_reduction <add>, %99, %cst_35 [0] : vector<16x256xf32> to vector<256xf32>
    %101 = vector.shape_cast %100 : vector<256xf32> to vector<1x256xf32>
    %102 = vector.extract_strided_slice %93 {offsets = [32, 0], sizes = [16, 256], strides = [1, 1]} : vector<48x256xf32> to vector<16x256xf32>
    %103 = arith.mulf %91, %102 : vector<16x256xf32>
    %cst_36 = arith.constant dense<0.000000e+00> : vector<256xf32>
    %104 = vector.multi_reduction <add>, %103, %cst_36 [0] : vector<16x256xf32> to vector<256xf32>
    %105 = vector.shape_cast %104 : vector<256xf32> to vector<1x256xf32>
    %106 = tpu.concatenate %97, %101, %105 in 0 : vector<1x256xf32>, vector<1x256xf32>, vector<1x256xf32> -> vector<3x256xf32>
    %107 = arith.addf %60, %106 : vector<3x256xf32>
    %cst_37 = arith.constant 6.250000e-01 : f32
    %108 = vector.broadcast %cst_37 : f32 to vector<8x256xf32>
    %109 = arith.mulf %108, %8 : vector<8x256xf32>
    %110 = arith.addf %6, %109 : vector<8x256xf32>
    %111 = vector.extract_strided_slice %110 {offsets = [0, 0], sizes = [1, 256], strides = [1, 1]} : vector<8x256xf32> to vector<1x256xf32>
    %cst_38 = arith.constant 0.000000e+00 : f32
    %cst_39 = arith.constant 1.000000e+00 : f32
    %112 = vector.broadcast %cst_38 : f32 to vector<1x256xf32>
    %113 = arith.maximumf %112, %111 : vector<1x256xf32>
    %114 = vector.broadcast %cst_39 : f32 to vector<1x256xf32>
    %115 = arith.minimumf %114, %113 : vector<1x256xf32>
    %cst_40 = arith.constant 1.500000e+01 : f32
    %116 = vector.broadcast %cst_40 : f32 to vector<1x256xf32>
    %117 = arith.mulf %115, %116 : vector<1x256xf32>
    %118 = vector.extract_strided_slice %110 {offsets = [1, 0], sizes = [1, 256], strides = [1, 1]} : vector<8x256xf32> to vector<1x256xf32>
    %cst_41 = arith.constant 0.000000e+00 : f32
    %cst_42 = arith.constant 1.000000e+00 : f32
    %119 = vector.broadcast %cst_41 : f32 to vector<1x256xf32>
    %120 = arith.maximumf %119, %118 : vector<1x256xf32>
    %121 = vector.broadcast %cst_42 : f32 to vector<1x256xf32>
    %122 = arith.minimumf %121, %120 : vector<1x256xf32>
    %cst_43 = arith.constant 1.500000e+01 : f32
    %123 = vector.broadcast %cst_43 : f32 to vector<1x256xf32>
    %124 = arith.mulf %122, %123 : vector<1x256xf32>
    %125 = vector.broadcast %117 : vector<1x256xf32> to vector<16x256xf32>
    %126 = arith.subf %10, %125 : vector<16x256xf32>
    %127 = math.absf %126 : vector<16x256xf32>
    %cst_44 = arith.constant 1.000000e+00 : f32
    %128 = vector.broadcast %cst_44 : f32 to vector<16x256xf32>
    %129 = arith.subf %128, %127 : vector<16x256xf32>
    %cst_45 = arith.constant 0.000000e+00 : f32
    %130 = vector.broadcast %cst_45 : f32 to vector<16x256xf32>
    %131 = arith.maximumf %129, %130 : vector<16x256xf32>
    %132 = vector.broadcast %124 : vector<1x256xf32> to vector<16x256xf32>
    %133 = arith.subf %12, %132 : vector<16x256xf32>
    %134 = math.absf %133 : vector<16x256xf32>
    %cst_46 = arith.constant 1.000000e+00 : f32
    %135 = vector.broadcast %cst_46 : f32 to vector<16x256xf32>
    %136 = arith.subf %135, %134 : vector<16x256xf32>
    %cst_47 = arith.constant 0.000000e+00 : f32
    %137 = vector.broadcast %cst_47 : f32 to vector<16x256xf32>
    %138 = arith.maximumf %136, %137 : vector<16x256xf32>
    %139 = arith.truncf %131 : vector<16x256xf32> to vector<16x256xbf16>
    %cst_48 = arith.constant dense<0.000000e+00> : vector<48x256xf32>
    %140 = tpu.matmul %5, %139, %cst_48 {dimension_numbers = #tpu.dot_dimension_numbers<[1], [0], [0], [1], [0, 0, 1, 1], [], []>} : vector<48x16xbf16>, vector<16x256xbf16>, vector<48x256xf32> -> vector<48x256xf32>
    %141 = vector.extract_strided_slice %140 {offsets = [0, 0], sizes = [16, 256], strides = [1, 1]} : vector<48x256xf32> to vector<16x256xf32>
    %142 = arith.mulf %138, %141 : vector<16x256xf32>
    %cst_49 = arith.constant dense<0.000000e+00> : vector<256xf32>
    %143 = vector.multi_reduction <add>, %142, %cst_49 [0] : vector<16x256xf32> to vector<256xf32>
    %144 = vector.shape_cast %143 : vector<256xf32> to vector<1x256xf32>
    %145 = vector.extract_strided_slice %140 {offsets = [16, 0], sizes = [16, 256], strides = [1, 1]} : vector<48x256xf32> to vector<16x256xf32>
    %146 = arith.mulf %138, %145 : vector<16x256xf32>
    %cst_50 = arith.constant dense<0.000000e+00> : vector<256xf32>
    %147 = vector.multi_reduction <add>, %146, %cst_50 [0] : vector<16x256xf32> to vector<256xf32>
    %148 = vector.shape_cast %147 : vector<256xf32> to vector<1x256xf32>
    %149 = vector.extract_strided_slice %140 {offsets = [32, 0], sizes = [16, 256], strides = [1, 1]} : vector<48x256xf32> to vector<16x256xf32>
    %150 = arith.mulf %138, %149 : vector<16x256xf32>
    %cst_51 = arith.constant dense<0.000000e+00> : vector<256xf32>
    %151 = vector.multi_reduction <add>, %150, %cst_51 [0] : vector<16x256xf32> to vector<256xf32>
    %152 = vector.shape_cast %151 : vector<256xf32> to vector<1x256xf32>
    %153 = tpu.concatenate %144, %148, %152 in 0 : vector<1x256xf32>, vector<1x256xf32>, vector<1x256xf32> -> vector<3x256xf32>
    %154 = arith.addf %107, %153 : vector<3x256xf32>
    %cst_52 = arith.constant 8.750000e-01 : f32
    %155 = vector.broadcast %cst_52 : f32 to vector<8x256xf32>
    %156 = arith.mulf %155, %8 : vector<8x256xf32>
    %157 = arith.addf %6, %156 : vector<8x256xf32>
    %158 = vector.extract_strided_slice %157 {offsets = [0, 0], sizes = [1, 256], strides = [1, 1]} : vector<8x256xf32> to vector<1x256xf32>
    %cst_53 = arith.constant 0.000000e+00 : f32
    %cst_54 = arith.constant 1.000000e+00 : f32
    %159 = vector.broadcast %cst_53 : f32 to vector<1x256xf32>
    %160 = arith.maximumf %159, %158 : vector<1x256xf32>
    %161 = vector.broadcast %cst_54 : f32 to vector<1x256xf32>
    %162 = arith.minimumf %161, %160 : vector<1x256xf32>
    %cst_55 = arith.constant 1.500000e+01 : f32
    %163 = vector.broadcast %cst_55 : f32 to vector<1x256xf32>
    %164 = arith.mulf %162, %163 : vector<1x256xf32>
    %165 = vector.extract_strided_slice %157 {offsets = [1, 0], sizes = [1, 256], strides = [1, 1]} : vector<8x256xf32> to vector<1x256xf32>
    %cst_56 = arith.constant 0.000000e+00 : f32
    %cst_57 = arith.constant 1.000000e+00 : f32
    %166 = vector.broadcast %cst_56 : f32 to vector<1x256xf32>
    %167 = arith.maximumf %166, %165 : vector<1x256xf32>
    %168 = vector.broadcast %cst_57 : f32 to vector<1x256xf32>
    %169 = arith.minimumf %168, %167 : vector<1x256xf32>
    %cst_58 = arith.constant 1.500000e+01 : f32
    %170 = vector.broadcast %cst_58 : f32 to vector<1x256xf32>
    %171 = arith.mulf %169, %170 : vector<1x256xf32>
    %172 = vector.broadcast %164 : vector<1x256xf32> to vector<16x256xf32>
    %173 = arith.subf %10, %172 : vector<16x256xf32>
    %174 = math.absf %173 : vector<16x256xf32>
    %cst_59 = arith.constant 1.000000e+00 : f32
    %175 = vector.broadcast %cst_59 : f32 to vector<16x256xf32>
    %176 = arith.subf %175, %174 : vector<16x256xf32>
    %cst_60 = arith.constant 0.000000e+00 : f32
    %177 = vector.broadcast %cst_60 : f32 to vector<16x256xf32>
    %178 = arith.maximumf %176, %177 : vector<16x256xf32>
    %179 = vector.broadcast %171 : vector<1x256xf32> to vector<16x256xf32>
    %180 = arith.subf %12, %179 : vector<16x256xf32>
    %181 = math.absf %180 : vector<16x256xf32>
    %cst_61 = arith.constant 1.000000e+00 : f32
    %182 = vector.broadcast %cst_61 : f32 to vector<16x256xf32>
    %183 = arith.subf %182, %181 : vector<16x256xf32>
    %cst_62 = arith.constant 0.000000e+00 : f32
    %184 = vector.broadcast %cst_62 : f32 to vector<16x256xf32>
    %185 = arith.maximumf %183, %184 : vector<16x256xf32>
    %186 = arith.truncf %178 : vector<16x256xf32> to vector<16x256xbf16>
    %cst_63 = arith.constant dense<0.000000e+00> : vector<48x256xf32>
    %187 = tpu.matmul %5, %186, %cst_63 {dimension_numbers = #tpu.dot_dimension_numbers<[1], [0], [0], [1], [0, 0, 1, 1], [], []>} : vector<48x16xbf16>, vector<16x256xbf16>, vector<48x256xf32> -> vector<48x256xf32>
    %188 = vector.extract_strided_slice %187 {offsets = [0, 0], sizes = [16, 256], strides = [1, 1]} : vector<48x256xf32> to vector<16x256xf32>
    %189 = arith.mulf %185, %188 : vector<16x256xf32>
    %cst_64 = arith.constant dense<0.000000e+00> : vector<256xf32>
    %190 = vector.multi_reduction <add>, %189, %cst_64 [0] : vector<16x256xf32> to vector<256xf32>
    %191 = vector.shape_cast %190 : vector<256xf32> to vector<1x256xf32>
    %192 = vector.extract_strided_slice %187 {offsets = [16, 0], sizes = [16, 256], strides = [1, 1]} : vector<48x256xf32> to vector<16x256xf32>
    %193 = arith.mulf %185, %192 : vector<16x256xf32>
    %cst_65 = arith.constant dense<0.000000e+00> : vector<256xf32>
    %194 = vector.multi_reduction <add>, %193, %cst_65 [0] : vector<16x256xf32> to vector<256xf32>
    %195 = vector.shape_cast %194 : vector<256xf32> to vector<1x256xf32>
    %196 = vector.extract_strided_slice %187 {offsets = [32, 0], sizes = [16, 256], strides = [1, 1]} : vector<48x256xf32> to vector<16x256xf32>
    %197 = arith.mulf %185, %196 : vector<16x256xf32>
    %cst_66 = arith.constant dense<0.000000e+00> : vector<256xf32>
    %198 = vector.multi_reduction <add>, %197, %cst_66 [0] : vector<16x256xf32> to vector<256xf32>
    %199 = vector.shape_cast %198 : vector<256xf32> to vector<1x256xf32>
    %200 = tpu.concatenate %191, %195, %199 in 0 : vector<1x256xf32>, vector<1x256xf32>, vector<1x256xf32> -> vector<3x256xf32>
    %201 = arith.addf %154, %200 : vector<3x256xf32>
    %cst_67 = arith.constant 2.500000e-01 : f32
    %202 = vector.broadcast %cst_67 : f32 to vector<3x256xf32>
    %203 = arith.mulf %201, %202 : vector<3x256xf32>
    %c0_68 = arith.constant 0 : index
    %c0_69 = arith.constant 0 : index
    %204 = vector.load %arg4[%c0_68, %c0_69] : memref<3x256xf32, #tpu.memory_space<vmem>>, vector<3x256xf32>
    tpu.vector_store %arg4[%c0_68, %c0_69], %203 {strides = array<i32>} : memref<3x256xf32, #tpu.memory_space<vmem>>, vector<3x256xf32>,
    return
  }
  func.func @transform_0(%arg0: i32) -> (i32, i32) {
    %c0_i32 = arith.constant 0 : i32
    %c0_i32_0 = arith.constant 0 : i32
    return %c0_i32, %arg0 : i32, i32
  }
  func.func @transform_1(%arg0: i32) -> (i32, i32) {
    %c0_i32 = arith.constant 0 : i32
    %c0_i32_0 = arith.constant 0 : i32
    return %c0_i32, %arg0 : i32, i32
  }
  func.func @transform_2(%arg0: i32) -> (i32, i32) {
    %c0_i32 = arith.constant 0 : i32
    %c0_i32_0 = arith.constant 0 : i32
    %c0_i32_1 = arith.constant 0 : i32
    return %c0_i32, %c0_i32_0 : i32, i32
  }
  func.func @transform_3(%arg0: i32) -> (i32, i32) {
    %c0_i32 = arith.constant 0 : i32
    %c0_i32_0 = arith.constant 0 : i32
    return %c0_i32, %arg0 : i32, i32
  }
}

</mosaic_0001>

<bundles_post_ra>
// kernel: tpu_custom_call.1
= control target key start
LH: loop header
LB: loop body
LE: loop exit
PB: predicated region body
PF: predicated region fallthrough
CT: control target
= control target key end

     0   :  { %v43_v2 = vlaneseq  ;;  %v849_v6 = vmov 0   ;;  %s1189_s0 = inlined_call_operand.vmem [shape: f32[8,256], index: 0, kind: input, shape index: {}]   ;;  %s1190_s1 = inlined_call_operand.vmem [shape: f32[8,256], index: 1, kind: input, shape index: {}]   ;;  %s1191_s2 = inlined_call_operand.vmem [shape: f32[48,16], index: 2, kind: input, shape index: {}]   ;;  %s1192_s3 = inlined_call_operand.hbm [shape: f32[3,256], index: 3, kind: output, shape index: {}]  }
   0x1   :  { %v38_v0 = vld [vmem:[%s1189_s0 + $0x8] sm:$0xff]  ;;  %v37_v3 = vld [vmem:[%s1189_s0] sm:$0xff]  ;;  %150 = vmatprep.mubr.bf16.mxu0 %v849_v6  ;;  %335 = vmatprep.mubr.bf16.mxu1 %v849_v6 }
   0x2   :  { %v40_v1 = vld [vmem:[%s1190_s1 + $0x8] sm:$0xff]  ;;  %v39_v5 = vld [vmem:[%s1190_s1] sm:$0xff]  ;;  %v891_v9 = vshrl.u32 %v43_v2, 7 }
   0x3   :  { %v42_v4 = vsub.f32 %v40_v1, %v38_v0  ;;  %v16_v7 = vld [vmem:[%s1191_s2] sm:$0xff]  ;;  %v17_v8 = vld [vmem:[%s1191_s2 + $0x8] sm:$0xff]  ;;  %v41_v10 = vsub.f32 %v39_v5, %v37_v3 }
   0x4   :  { %v22_v11 = vmax.f32 %v16_v7, 0.0  ;;  %v23_v12 = vmax.f32 %v17_v8, 0.0  ;;  %v45_v17 = vadd.s32 8, %v891_v9  ;;  %v895_v18 = vcvt.s32.f32 %v891_v9 }
   0x5   :  { %v49_v13 = vmul.f32 0.125, %v42_v4  ;;  %v244_v14 = vmul.f32 0.375, %v42_v4  ;;  %v427_v15 = vmul.f32 0.625, %v42_v4  ;;  %v610_v16 = vmul.f32 0.875, %v42_v4 }
   0x6   :  { %v898_v19 = vsub.s32 0, %v891_v9  ;;  %v48_v20 = vmul.f32 0.125, %v41_v10 }
   0x7   :  { %8 = vsyncpa [#allocation3], 0  ;;  %v51_v21 = vadd.f32 %v49_v13, %v38_v0  ;;  %v246_v22 = vadd.f32 %v244_v14, %v38_v0  ;;  %v243_v23 = vmul.f32 0.375, %v41_v10  ;;  %v28_v24 = vmin.f32 %v22_v11, 1.0 }
   0x8   :  { %v900_v25 = vcvt.s32.f32 %v45_v17  ;;  %v50_v26 = vadd.f32 %v48_v20, %v37_v3  ;;  %v29_v27 = vmin.f32 %v23_v12, 1.0  ;;  %v429_v28 = vadd.f32 %v427_v15, %v38_v0 }
   0x9   :  { %v53_v29 = vmax.f32 %v51_v21, 0.0  ;;  %v248_v30 = vmax.f32 %v246_v22, 0.0  ;;  %v245_v31 = vadd.f32 %v243_v23, %v37_v3  ;;  %v426_v32 = vmul.f32 0.625, %v41_v10 }
   0xa   :  { %v52_v33 = vmax.f32 %v50_v26, 0.0  ;;  %v902_v34 = vpack.c.bf16 %v29_v27, %v28_v24  ;;  %v431_v35 = vmax.f32 %v429_v28, 0.0  ;;  %v612_v36 = vadd.f32 %v610_v16, %v38_v0 }
   0xb   :  { %v55_v37 = vmin.f32 %v53_v29, 1.0  ;;  %v250_v38 = vmin.f32 %v248_v30, 1.0  ;;  %v247_v39 = vmax.f32 %v245_v31, 0.0  ;;  %v428_v40 = vadd.f32 %v426_v32, %v37_v3 }
   0xc   :  { %v54_v41 = vmin.f32 %v52_v33, 1.0  ;;  %v433_v42 = vmin.f32 %v431_v35, 1.0  ;;  %v614_v43 = vmax.f32 %v612_v36, 0.0  ;;  %v609_v44 = vmul.f32 0.875, %v41_v10  ;;  %v18_v35 = vld [vmem:[%s1191_s2 + $0x10] sm:$0xff] }
   0xd   :  { %v904_v45 = vmul.f32 15.0, %v55_v37  ;;  %v906_v46 = vmul.f32 15.0, %v250_v38  ;;  %v249_v47 = vmin.f32 %v247_v39, 1.0  ;;  %v430_v48 = vmax.f32 %v428_v40, 0.0  ;;  %v19_v40 = vld [vmem:[%s1191_s2 + $0x18] sm:$0xff] }
   0xe   :  { %v908_v49 = vmul.f32 15.0, %v54_v41  ;;  %v910_v50 = vmul.f32 15.0, %v433_v42  ;;  %v616_v51 = vmin.f32 %v614_v43, 1.0  ;;  %v611_v52 = vadd.f32 %v609_v44, %v37_v3 }
   0xf   :  { %v65_v53 = vrot.slane %v904_v45, %v898_v19  ;;  %v260_v54 = vrot.slane %v906_v46, %v898_v19  ;;  %v916_v55 = vmul.f32 15.0, %v249_v47  ;;  %v432_v56 = vmin.f32 %v430_v48, 1.0 }
  0x10   :  { %v61_v57 = vrot.slane %v908_v49, %v898_v19  ;;  %v443_v58 = vrot.slane %v910_v50, %v898_v19  ;;  %v922_v59 = vmul.f32 15.0, %v616_v51  ;;  %v613_v60 = vmax.f32 %v611_v52, 0.0 }
  0x11   :  { %v67_v61 = vsub.f32 %v895_v18, %v65_v53  ;;  %v69_v62 = vsub.f32 %v900_v25, %v65_v53  ;;  %v262_v63 = vsub.f32 %v895_v18, %v260_v54  ;;  %v264_v0 = vsub.f32 %v900_v25, %v260_v54 }
  0x12   :  { %v66_v1 = vsub.f32 %v895_v18, %v61_v57  ;;  %v68_v2 = vsub.f32 %v900_v25, %v61_v57  ;;  %v256_v3 = vrot.slane %v916_v55, %v898_v19  ;;  %v445_v4 = vsub.f32 %v895_v18, %v443_v58 }
  0x13   :  { %v71_v5 = vand.u32 2147483647, %v67_v61  ;;  %v73_v7 = vand.u32 2147483647, %v69_v62  ;;  %v266_v8 = vand.u32 2147483647, %v262_v63  ;;  %v447_v10 = vsub.f32 %v900_v25, %v443_v58 }
  0x14   :  { %v268_v11 = vand.u32 2147483647, %v264_v0  ;;  %v70_v12 = vand.u32 2147483647, %v66_v1  ;;  %v72_v13 = vand.u32 2147483647, %v68_v2  ;;  %v261_v14 = vsub.f32 %v895_v18, %v256_v3 }
  0x15   :  { %vm108_vm0 = vcmask 130048   ;;  %v75_v15 = vsub.f32 1.0, %v71_v5  ;;  %v77_v16 = vsub.f32 1.0, %v73_v7  ;;  %v270_v17 = vsub.f32 1.0, %v266_v8  ;;  %v20_v8 = vld [vmem:[%s1191_s2 + $0x20] sm:$0xff] }
  0x16   :  { %v263_v20 = vsub.f32 %v900_v25, %v256_v3  ;;  %v272_v21 = vsub.f32 1.0, %v268_v11  ;;  %v74_v22 = vsub.f32 1.0, %v70_v12  ;;  %v76_v23 = vsub.f32 1.0, %v72_v13 }
  0x17   :  { %v265_v24 = vand.u32 2147483647, %v261_v14  ;;  %v79_v26 = vmax.f32 %v75_v15, 0.0  ;;  %v81_v27 = vmax.f32 %v77_v16, 0.0  ;;  %v274_v28 = vmax.f32 %v270_v17, 0.0 }
  0x18   :  { %v267_v29 = vand.u32 2147483647, %v263_v20  ;;  %v276_v30 = vmax.f32 %v272_v21, 0.0  ;;  %v78_v31 = vmax.f32 %v74_v22, 0.0  ;;  %v80_v32 = vmax.f32 %v76_v23, 0.0 }
  0x19   :  { %v269_v33 = vsub.f32 1.0, %v265_v24  ;;  %v107_v36 = vpack.c.bf16 %v81_v27, %v79_v26  ;;  %v449_v38 = vand.u32 2147483647, %v445_v4  ;;  %v451_v39 = vand.u32 2147483647, %v447_v10  ;;  %v21_v10 = vld [vmem:[%s1191_s2 + $0x28] sm:$0xff] }
  0x1a   :  { %v271_v37 = vsub.f32 1.0, %v267_v29  ;;  %v302_v41 = vpack.c.bf16 %v276_v30, %v274_v28  ;;  %v106_v42 = vpack.c.bf16 %v80_v32, %v78_v31  ;;  %v942_v44 = vmul.f32 15.0, %v432_v56  ;;  %s850_s2 = smov [#allocation2]  }
  0x1b   :  { %v273_v43 = vmax.f32 %v269_v33, 0.0  ;;  %132 = vmatprep.subr.bf16.mxu0 %v107_v36  ;;  %v453_v48 = vsub.f32 1.0, %v449_v38  ;;  %v455_v51 = vsub.f32 1.0, %v451_v39  ;;  %v626_v52 = vrot.slane %v922_v59, %v898_v19  ;;  %s805_s30 = sshll.u32 %s850_s2, 4  ;;  %s806_s30 = int_to_ptr.vmem [resolvable:$true] %s805_s30 }
  0x1c   :  { %v275_v47 = vmax.f32 %v271_v37, 0.0  ;;  %317 = vmatprep.subr.bf16.mxu1 %v302_v41  ;;  %133 = vmatpush1.bf16.msra.mxu0 %v106_v42  ;;  %v439_v53 = vrot.slane %v942_v44, %v898_v19  ;;  %v615_v54 = vmin.f32 %v613_v60, 1.0  ;;  %v24_v57 = vmax.f32 %v18_v35, 0.0  ;;  %s827_s4 = scalar_lea.vmem %s806_s30, 128  ;;  %p832_p1 = scmp.lt.s32.totalorder %s806_s30, %s806_s30 }
  0x1d   :  { %v25_v58 = vmax.f32 %v19_v40, 0.0  ;;  %v457_v62 = vmax.f32 %v453_v48, 0.0  ;;  %v459_v63 = vmax.f32 %v455_v51, 0.0  ;;  %v628_v56 = vsub.f32 %v895_v18, %v626_v52  ;;  %p828_p0 = scmp.ne.s32.totalorder %s806_s30, %s827_s4  ;;  %p833_p2 = scmp.lt.s32.totalorder %s827_s4, %s827_s4 }
  0x1e   :  { %v301_v61 = vpack.c.bf16 %v275_v47, %v273_v43  ;;  %v444_v0 = vsub.f32 %v895_v18, %v439_v53  ;;  %v446_v1 = vsub.f32 %v900_v25, %v439_v53  ;;  %v630_v2 = vsub.f32 %v900_v25, %v626_v52 }
  0x1f   :  { %v952_v3 = vmul.f32 15.0, %v615_v54  ;;  %813 = vmatmul.mubr.msk.bf16.vlgmr.msra.gmra.mxu0 %vm108_vm0, %v902_v34  ;;  %v485_v60 = vpack.c.bf16 %v459_v63, %v457_v62  ;;  %v632_v4 = vand.u32 2147483647, %v628_v56  ;;  %v30_v5 = vmin.f32 %v24_v57, 1.0  ;;  %p834_p3 = por %p833_p2, %p832_p1 }
  0x20   :  { %318 = vmatpush1.bf16.msra.mxu1 %v301_v61  ;;  %v31_v7 = vmin.f32 %v25_v58, 1.0  ;;  %v448_v11 = vand.u32 2147483647, %v444_v0  ;;  %v450_v12 = vand.u32 2147483647, %v446_v1  ;;  %160 = vmatprep.mubr.bf16.mxu0 %v849_v6  ;;  %v26_v26 = vmax.f32 %v20_v8, 0.0 }
  0x21   :  { %v634_v13 = vand.u32 2147483647, %v630_v2  ;;  %v622_v14 = vrot.slane %v952_v3, %v898_v19  ;;  %500 = vmatprep.subr.bf16.mxu0 %v485_v60  ;;  %v636_v15 = vsub.f32 1.0, %v632_v4  ;;  %v27_v19 = vmax.f32 %v21_v10, 0.0  ;;  %p835_p4 = pnand %p834_p3, %p828_p0 }
  0x22   :  { %v35_v16 = vpack.c.bf16 %v31_v7, %v30_v5  ;;  %v452_v17 = vsub.f32 1.0, %v448_v11  ;;  %v454_v20 = vsub.f32 1.0, %v450_v12  ;;  %v84_v32 = vsub.s32 1, %v891_v9 }
  0x23   :  { %816 = vmatmul.mubr.msk.bf16.vlgmr.msra.gmra.mxu1 %vm108_vm0, %v902_v34  ;;  %v638_v21 = vsub.f32 1.0, %v634_v13  ;;  %v627_v22 = vsub.f32 %v895_v18, %v622_v14  ;;  %v640_v23 = vmax.f32 %v636_v15, 0.0  ;;  %v629_v24 = vsub.f32 %v900_v25, %v622_v14 }
  0x24   :  { %345 = vmatprep.mubr.bf16.mxu1 %v849_v6  ;;  %v456_v27 = vmax.f32 %v452_v17, 0.0  ;;  %v458_v28 = vmax.f32 %v454_v20, 0.0  ;;  %v32_v38 = vmin.f32 %v26_v26, 1.0  ;;  %v33_v39 = vmin.f32 %v27_v19, 1.0 }
  0x25   :  { %v642_v29 = vmax.f32 %v638_v21, 0.0  ;;  %v631_v30 = vand.u32 2147483647, %v627_v22  ;;  %v633_v31 = vand.u32 2147483647, %v629_v24  ;;  %v85_v40 = vrot.slane %v908_v49, %v84_v32 }
  0x26   :  { %v484_v33 = vpack.c.bf16 %v458_v28, %v456_v27  ;;  %v36_v9 = vpack.c.bf16 %v33_v39, %v32_v38  ;;  %v89_v49 = vrot.slane %v904_v45, %v84_v32  ;;  %v280_v47 = vrot.slane %v916_v55, %v84_v32 }
  0x27   :  { %v668_v35 = vpack.c.bf16 %v642_v29, %v640_v23  ;;  %v635_v36 = vsub.f32 1.0, %v631_v30  ;;  %v637_v37 = vsub.f32 1.0, %v633_v31  ;;  %814 = vmatmul.mubr.msk.bf16.gmra.mxu0 %vm108_vm0, %v35_v16  ;;  %v284_v48 = vrot.slane %v906_v46, %v84_v32 }
  0x28   :  { %501 = vmatpush1.bf16.msra.mxu0 %v484_v33  ;;  %170 = vmatprep.mubr.bf16.mxu0 %v849_v6  ;;  %v92_v51 = vsub.f32 %v900_v25, %v85_v40  ;;  %v463_v52 = vrot.slane %v942_v44, %v84_v32  ;;  %v91_v53 = vsub.f32 %v895_v18, %v89_v49  ;;  %vm235_vm1 = vcmask 1040384  }
  0x29   :  { %683 = vmatprep.subr.bf16.mxu1 %v668_v35  ;;  %v639_v41 = vmax.f32 %v635_v36, 0.0  ;;  %v641_v42 = vmax.f32 %v637_v37, 0.0  ;;  %v285_v54 = vsub.f32 %v895_v18, %v280_v47  ;;  %v287_v57 = vsub.f32 %v900_v25, %v280_v47 }
  0x2a   :  { %v286_v45 = vsub.f32 %v895_v18, %v284_v48  ;;  %v96_v55 = vand.u32 2147483647, %v92_v51  ;;  %v646_v61 = vrot.slane %v952_v3, %v84_v32  ;;  %v288_v46 = vsub.f32 %v900_v25, %v284_v48 }
  0x2b   :  { %817 = vmatmul.mubr.msk.bf16.gmra.mxu1 %vm108_vm0, %v35_v16  ;;  %v667_v43 = vpack.c.bf16 %v641_v42, %v639_v41  ;;  %v468_v62 = vsub.f32 %v895_v18, %v463_v52  ;;  %v1007_v44 = vrot.slane %v910_v50, %v84_v32  ;;  %v95_v63 = vand.u32 2147483647, %v91_v53 }
  0x2c   :  { %355 = vmatprep.mubr.bf16.mxu1 %v849_v6  ;;  %v289_v0 = vand.u32 2147483647, %v285_v54  ;;  %v291_v1 = vand.u32 2147483647, %v287_v57  ;;  %v1010_v2 = vrot.slane %v922_v59, %v84_v32  ;;  %v290_v4 = vand.u32 2147483647, %v286_v45 }
  0x2d   :  { %684 = vmatpush1.bf16.msra.mxu1 %v667_v43  ;;  %v100_v5 = vsub.f32 1.0, %v96_v55  ;;  %v651_v7 = vsub.f32 %v895_v18, %v646_v61  ;;  %v292_v3 = vand.u32 2147483647, %v288_v46  ;;  %v472_v8 = vand.u32 2147483647, %v468_v62 }
  0x2e   :  { %v469_v10 = vsub.f32 %v895_v18, %v1007_v44  ;;  %v99_v11 = vsub.f32 1.0, %v95_v63  ;;  %v293_v13 = vsub.f32 1.0, %v289_v0  ;;  %v295_v14 = vsub.f32 1.0, %v291_v1 }
  0x2f   :  { %815 = vmatmul.mubr.msk.bf16.gmra.mxu0 %vm108_vm0, %v36_v9  ;;  %v652_v15 = vsub.f32 %v895_v18, %v1010_v2  ;;  %v1019_v17 = vmax.f32 %v100_v5, 0.0  ;;  %v655_v20 = vand.u32 2147483647, %v651_v7  ;;  %v296_v22 = vsub.f32 1.0, %v292_v3 }
  0x30   :  { %518 = vmatprep.mubr.bf16.mxu0 %v849_v6  ;;  %v476_v23 = vsub.f32 1.0, %v472_v8  ;;  %v473_v24 = vand.u32 2147483647, %v469_v10  ;;  %v1021_v19 = vmax.f32 %v99_v11, 0.0  ;;  %v470_v28 = vsub.f32 %v900_v25, %v463_v52 }
  0x31   :  { %v1026_v29 = vmax.f32 %v293_v13, 0.0  ;;  %v1028_v30 = vmax.f32 %v295_v14, 0.0  ;;  %v656_v31 = vand.u32 2147483647, %v652_v15  ;;  %v653_v32 = vsub.f32 %v900_v25, %v646_v61 }
  0x32   :  { %v659_v38 = vsub.f32 1.0, %v655_v20  ;;  %v1037_v41 = vmax.f32 %v476_v23, 0.0  ;;  %v477_v42 = vsub.f32 1.0, %v473_v24  ;;  %v471_v43 = vsub.f32 %v900_v25, %v1007_v44 }
  0x33   :  { %818 = vmatmul.mubr.msk.bf16.gmra.mxu1 %vm108_vm0, %v36_v9  ;;  %v1043_v48 = vand.u32 2147483647, %v470_v28  ;;  %v657_v54 = vand.u32 2147483647, %v653_v32  ;;  %v654_v61 = vsub.f32 %v900_v25, %v1010_v2  ;;  %vm238_vm2 = vcmask 1041408  }
  0x34   :  { %701 = vmatprep.mubr.bf16.mxu1 %v849_v6  ;;  %v1047_v55 = vmax.f32 %v659_v38, 0.0 }
  0x35   :  { %v478_v5 = vsub.f32 1.0, %v1043_v48  ;;  %v658_v13 = vand.u32 2147483647, %v654_v61 }
  0x37   :  { %819 = vmatmul.mubr.msk.bf16.vlgmr.msra.gmra.mxu0 %vm108_vm0, %v902_v34  ;;  %v1066_v61 = vmax.f32 %v478_v5, 0.0 }
  0x38   :  { %528 = vmatprep.mubr.bf16.mxu0 %v849_v6 }
  0x3b   :  { %822 = vmatmul.mubr.msk.bf16.vlgmr.msra.gmra.mxu1 %vm108_vm0, %v902_v34  ;;  %v90_v34 = vsub.f32 %v895_v18, %v85_v40  ;;  %v1035_v40 = vmax.f32 %v296_v22, 0.0 }
  0x3c   :  { %711 = vmatprep.mubr.bf16.mxu1 %v849_v6 }
  0x3d   :  { %v94_v58 = vand.u32 2147483647, %v90_v34 }
  0x3f   :  { %820 = vmatmul.mubr.msk.bf16.gmra.mxu0 %vm108_vm0, %v35_v16  ;;  %v98_v60 = vsub.f32 1.0, %v94_v58 }
  0x40   :  { %538 = vmatprep.mubr.bf16.mxu0 %v849_v6 }
  0x41   :  { %v1017_v59 = vmax.f32 %v98_v60, 0.0 }
  0x43   :  { %823 = vmatmul.mubr.msk.bf16.gmra.mxu1 %vm108_vm0, %v35_v16  ;;  %v294_v16 = vsub.f32 1.0, %v290_v4  ;;  %v1053_v4 = vmax.f32 %v477_v42, 0.0 }
  0x44   :  { %721 = vmatprep.mubr.bf16.mxu1 %v849_v6  ;;  %v93_v6 = vsub.f32 %v900_v25, %v89_v49  ;;  %v661_v25 = vsub.f32 1.0, %v657_v54 }
  0x45   :  { %v1032_v35 = vmax.f32 %v294_v16, 0.0 }
  0x46   :  { %v97_v56 = vand.u32 2147483647, %v93_v6  ;;  %v660_v6 = vsub.f32 1.0, %v656_v31 }
  0x47   :  { %821 = vmatmul.mubr.msk.bf16.gmra.mxu0 %vm108_vm0, %v36_v9 }
  0x48   :  { %v101_v50 = vsub.f32 1.0, %v97_v56  ;;  %v475_v56 = vand.u32 2147483647, %v471_v43  ;;  %v1056_v10 = vmax.f32 %v660_v6, 0.0  ;;  %v662_v43 = vsub.f32 1.0, %v658_v13 }
  0x4a   :  { %v1023_v27 = vmax.f32 %v101_v50, 0.0 }
  0x4b   :  { %824 = vmatmul.mubr.msk.bf16.gmra.mxu1 %vm108_vm0, %v36_v9 }
  0xdf   :  { %v152_v12 = vpop.f32.mrf.mxu0 }
  0xe0   :  { %v181_v33 = vmul.f32 %v152_v12, %v1017_v59 }
  0xe1   :  { %v154_v21 = vpop.f32.mrf.mxu0 }
  0xe2   :  { %v182_v9 = vmul.f32 %v154_v21, %v1021_v19  ;;  %v479_v21 = vsub.f32 1.0, %v475_v56 }
  0xe3   :  { %v337_v26 = vpop.f32.mrf.mxu1  ;;  %v156_v18 = vpop.f32.mrf.mxu0 }
  0xe4   :  { %v183_v37 = vmul.f32 %v156_v18, %v1019_v17  ;;  %v366_v51 = vmul.f32 %v337_v26, %v1026_v29  ;;  %v1070_v56 = vmax.f32 %v479_v21, 0.0 }
  0xe5   :  { %v339_v36 = vpop.f32.mrf.mxu1  ;;  %v158_v39 = vpop.f32.mrf.mxu0 }
  0xe6   :  { %v185_v49 = vadd.f32 %v183_v37, %v181_v33  ;;  %v184_v34 = vmul.f32 %v158_v39, %v1023_v27  ;;  %v367_v46 = vmul.f32 %v339_v36, %v1032_v35 }
  0xe7   :  { %v341_v47 = vpop.f32.mrf.mxu1  ;;  %v162_v53 = vpop.f32.mrf.mxu0 }
  0xe8   :  { %v368_v52 = vmul.f32 %v341_v47, %v1028_v30  ;;  %v186_v57 = vrot.slane %v185_v49, 4  ;;  %v192_v58 = vadd.f32 %v184_v34, %v182_v9  ;;  %v199_v11 = vmul.f32 %v162_v53, %v1017_v59 }
  0xe9   :  { %v343_v45 = vpop.f32.mrf.mxu1  ;;  %v164_v63 = vpop.f32.mrf.mxu0 }
  0xea   :  { %v370_v62 = vadd.f32 %v368_v52, %v366_v51  ;;  %v369_v44 = vmul.f32 %v343_v45, %v1035_v40  ;;  %v187_v0 = vadd.f32 %v186_v57, %v185_v49  ;;  %v193_v1 = vrot.slane %v192_v58, 4 }
  0xeb   :  { %v347_v60 = vpop.f32.mrf.mxu1  ;;  %v166_v8 = vpop.f32.mrf.mxu0  ;;  %v200_v23 = vmul.f32 %v164_v63, %v1021_v19 }
  0xec   :  { %v371_v7 = vrot.slane %v370_v62, 4  ;;  %v377_v3 = vadd.f32 %v369_v44, %v367_v46  ;;  %v194_v2 = vadd.f32 %v193_v1, %v192_v58  ;;  %v201_v12 = vmul.f32 %v166_v8, %v1019_v17 }
  0xed   :  { %v349_v50 = vpop.f32.mrf.mxu1  ;;  %v188_v14 = vrot.slane %v187_v0, 2  ;;  %v168_v20 = vpop.f32.mrf.mxu0  ;;  %v384_v32 = vmul.f32 %v347_v60, %v1026_v29  ;;  %v1068_v46 = vmax.f32 %v661_v25, 0.0 }
  0xee   :  { %v372_v15 = vadd.f32 %v371_v7, %v370_v62  ;;  %v378_v16 = vrot.slane %v377_v3, 4  ;;  %v195_v22 = vrot.slane %v194_v2, 2  ;;  %v203_v24 = vadd.f32 %v201_v12, %v199_v11 }
  0xef   :  { %v351_v26 = vpop.f32.mrf.mxu1  ;;  %v202_v28 = vmul.f32 %v168_v20, %v1023_v27  ;;  %v172_v36 = vpop.f32.mrf.mxu0  ;;  %v385_v37 = vmul.f32 %v349_v50, %v1032_v35  ;;  %v189_v9 = vadd.f32 %v188_v14, %v187_v0  ;;  %v1072_v0 = vmax.f32 %v662_v43, 0.0 }
  0xf0   :  { %v373_v18 = vrot.slane %v372_v15, 2  ;;  %v379_v31 = vadd.f32 %v378_v16, %v377_v3  ;;  %v386_v33 = vmul.f32 %v351_v26, %v1028_v30  ;;  %v204_v38 = vrot.slane %v203_v24, 4 }
  0xf1   :  { %v210_v39 = vadd.f32 %v202_v28, %v200_v23  ;;  %v353_v42 = vpop.f32.mrf.mxu1  ;;  %v196_v49 = vadd.f32 %v195_v22, %v194_v2  ;;  %v174_v48 = vpop.f32.mrf.mxu0  ;;  %v190_v1 = vrot.slane %v189_v9, 1  ;;  %v217_v5 = vmul.f32 %v172_v36, %v1017_v59 }
  0xf2   :  { %v388_v47 = vadd.f32 %v386_v33, %v384_v32  ;;  %v387_v34 = vmul.f32 %v353_v42, %v1035_v40  ;;  %v374_v51 = vadd.f32 %v373_v18, %v372_v15  ;;  %v380_v52 = vrot.slane %v379_v31, 2 }
  0xf3   :  { %v205_v53 = vadd.f32 %v204_v38, %v203_v24  ;;  %v211_v6 = vrot.slane %v210_v39, 4  ;;  %v357_v54 = vpop.f32.mrf.mxu1  ;;  %v176_v45 = vpop.f32.mrf.mxu0  ;;  %v197_v60 = vrot.slane %v196_v49, 1  ;;  %v218_v15 = vmul.f32 %v174_v48, %v1021_v19 }
  0xf4   :  { %v389_v57 = vrot.slane %v388_v47, 4  ;;  %v395_v58 = vadd.f32 %v387_v34, %v385_v37  ;;  %v375_v2 = vrot.slane %v374_v51, 1  ;;  %v1074_v11 = vadd.f32 %v380_v52, %v379_v31 }
  0xf5   :  { %v206_v62 = vrot.slane %v205_v53, 2  ;;  %v212_v44 = vadd.f32 %v211_v6, %v210_v39  ;;  %v359_v63 = vpop.f32.mrf.mxu1  ;;  %v178_v8 = vpop.f32.mrf.mxu0  ;;  %v402_v14 = vmul.f32 %v357_v54, %v1026_v29  ;;  %v219_v22 = vmul.f32 %v176_v45, %v1019_v17 }
  0xf6   :  { %v390_v7 = vadd.f32 %v389_v57, %v388_v47  ;;  %v396_v3 = vrot.slane %v395_v58, 4  ;;  %v403_v21 = vmul.f32 %v359_v63, %v1032_v35  ;;  %v220_v28 = vmul.f32 %v178_v8, %v1023_v27 }
  0xf7   :  { %v213_v50 = vrot.slane %v212_v44, 2  ;;  %v361_v25 = vpop.f32.mrf.mxu1  ;;  %v1077_v12 = vadd.f32 %v206_v62, %v205_v53  ;;  %v520_v16 = vpop.f32.mrf.mxu0  ;;  %v1088_v29 = vadd.f32 %v190_v1, %v189_v9  ;;  %v1090_v19 = vadd.f32 %v197_v60, %v196_v49 }
  0xf8   :  { %v397_v13 = vadd.f32 %v396_v3, %v395_v58  ;;  %v391_v20 = vrot.slane %v390_v7, 2  ;;  %v404_v23 = vmul.f32 %v361_v25, %v1028_v30  ;;  %v221_v32 = vadd.f32 %v219_v22, %v217_v5 }
  0xf9   :  { %v363_v24 = vpop.f32.mrf.mxu1  ;;  %v1084_v26 = vadd.f32 %v213_v50, %v212_v44  ;;  %v522_v31 = vpop.f32.mrf.mxu0  ;;  %v1092_v36 = vadd.f32 %v375_v2, %v374_v51  ;;  %v382_v17 = vrot.slane %v1074_v11, 1  ;;  %v228_v30 = vadd.f32 %v220_v28, %v218_v15 }
  0xfa   :  { %v398_v59 = vrot.slane %v397_v13, 2  ;;  %v405_v18 = vmul.f32 %v363_v24, %v1035_v40  ;;  %v406_v33 = vadd.f32 %v404_v23, %v402_v14  ;;  %v208_v39 = vrot.slane %v1077_v12, 1 }
  0xfb   :  { %v703_v35 = vpop.f32.mrf.mxu1  ;;  %v524_v38 = vpop.f32.mrf.mxu0  ;;  %v392_v27 = vadd.f32 %v391_v20, %v390_v7  ;;  %v222_v42 = vrot.slane %v221_v32, 4  ;;  %v215_v9 = vrot.slane %v1084_v26, 1  ;;  %v229_v47 = vrot.slane %v228_v30, 4 }
  0xfc   :  { %v413_v37 = vadd.f32 %v405_v18, %v403_v21  ;;  %v407_v40 = vrot.slane %v406_v33, 4  ;;  %v399_v49 = vadd.f32 %v398_v59, %v397_v13  ;;  %v549_v53 = vmul.f32 %v520_v16, %v1037_v41 }
  0xfd   :  { %v705_v43 = vpop.f32.mrf.mxu1  ;;  %v526_v48 = vpop.f32.mrf.mxu0  ;;  %v223_v52 = vadd.f32 %v222_v42, %v221_v32  ;;  %v732_v6 = vmul.f32 %v703_v35, %v1047_v55  ;;  %v230_v57 = vadd.f32 %v229_v47, %v228_v30  ;;  %v550_v45 = vmul.f32 %v522_v31, %v1053_v4 }
  0xfe   :  { %v414_v34 = vrot.slane %v413_v37, 4  ;;  %v408_v51 = vadd.f32 %v407_v40, %v406_v33  ;;  %v733_v62 = vmul.f32 %v705_v43, %v1056_v10  ;;  %v551_v60 = vmul.f32 %v524_v38, %v1066_v61 }
  0xff   :  { %v707_v54 = vpop.f32.mrf.mxu1  ;;  %v530_v44 = vpop.f32.mrf.mxu0  ;;  %v224_v63 = vrot.slane %v223_v52, 2  ;;  %v231_v8 = vrot.slane %v230_v57, 2  ;;  %v552_v50 = vmul.f32 %v526_v48, %v1070_v56  ;;  %v393_v13 = vrot.slane %v392_v27, 1 }
 0x100   :  { %v415_v58 = vadd.f32 %v414_v34, %v413_v37  ;;  %v409_v1 = vrot.slane %v408_v51, 2  ;;  %v734_v7 = vmul.f32 %v707_v54, %v1068_v46  ;;  %v400_v14 = vrot.slane %v399_v49, 1 }
 0x101   :  { %v709_v3 = vpop.f32.mrf.mxu1  ;;  %v532_v25 = vpop.f32.mrf.mxu0  ;;  %v553_v15 = vadd.f32 %v551_v60, %v549_v53  ;;  %v225_v21 = vadd.f32 %v224_v63, %v223_v52  ;;  %v560_v23 = vadd.f32 %v552_v50, %v550_v45  ;;  %v232_v28 = vadd.f32 %v231_v8, %v230_v57 }
 0x102   :  { %v416_v2 = vrot.slane %v415_v58, 2  ;;  %v735_v5 = vmul.f32 %v709_v3, %v1072_v0  ;;  %v736_v16 = vadd.f32 %v734_v7, %v732_v6  ;;  %v410_v22 = vadd.f32 %v409_v1, %v408_v51 }
 0x103   :  { %v713_v20 = vpop.f32.mrf.mxu1  ;;  %v534_v59 = vpop.f32.mrf.mxu0  ;;  %v554_v31 = vrot.slane %v553_v15, 4  ;;  %v1106_v35 = vadd.f32 %v382_v17, %v1074_v11  ;;  %v1109_v30 = vadd.f32 %v208_v39, %v1077_v12  ;;  %v561_v37 = vrot.slane %v560_v23, 4 }
 0x104   :  { %v743_v24 = vadd.f32 %v735_v5, %v733_v62  ;;  %v417_v18 = vadd.f32 %v416_v2, %v415_v58  ;;  %v737_v32 = vrot.slane %v736_v16, 4  ;;  %v1111_v40 = vadd.f32 %v393_v13, %v392_v27 }
 0x105   :  { %v715_v33 = vpop.f32.mrf.mxu1  ;;  %v536_v42 = vpop.f32.mrf.mxu0  ;;  %v1114_v43 = vadd.f32 %v215_v9, %v1084_v26  ;;  %v555_v47 = vadd.f32 %v554_v31, %v553_v15  ;;  %v1116_v52 = vadd.f32 %v400_v14, %v399_v49  ;;  %v226_v51 = vrot.slane %v225_v21, 1 }
 0x106   :  { %v744_v38 = vrot.slane %v743_v24, 4  ;;  %v738_v34 = vadd.f32 %v737_v32, %v736_v16  ;;  %v562_v53 = vadd.f32 %v561_v37, %v560_v23  ;;  %v411_v6 = vrot.slane %v410_v22, 1 }
 0x107   :  { %v717_v48 = vpop.f32.mrf.mxu1  ;;  %v540_v17 = vpop.f32.mrf.mxu0  ;;  %v233_v12 = vrot.slane %v232_v28, 1  ;;  %v418_v39 = vrot.slane %v417_v18, 1  ;;  %v556_v54 = vrot.slane %v555_v47, 2  ;;  %v567_v45 = vmul.f32 %v530_v44, %v1037_v41 }
 0x108   :  { %v745_v11 = vadd.f32 %v744_v38, %v743_v24  ;;  %v739_v58 = vrot.slane %v738_v34, 2  ;;  %v563_v27 = vrot.slane %v562_v53, 2  ;;  %v750_v26 = vmul.f32 %v713_v20, %v1047_v55 }
 0x109   :  { %v719_v57 = vpop.f32.mrf.mxu1  ;;  %v542_v9 = vpop.f32.mrf.mxu0  ;;  %v568_v49 = vmul.f32 %v532_v25, %v1053_v4  ;;  %v569_v63 = vmul.f32 %v534_v59, %v1066_v61  ;;  %v752_v1 = vmul.f32 %v717_v48, %v1068_v46  ;;  %v1123_v7 = vadd.f32 %v556_v54, %v555_v47 }
 0x10a   :  { %v746_v62 = vrot.slane %v745_v11, 2  ;;  %v751_v3 = vmul.f32 %v715_v33, %v1056_v10  ;;  %v570_v8 = vmul.f32 %v536_v42, %v1070_v56  ;;  %v753_v2 = vmul.f32 %v719_v57, %v1072_v0 }
 0x10b   :  { %v723_v60 = vpop.f32.mrf.mxu1  ;;  %v1128_v44 = vadd.f32 %v226_v51, %v225_v21  ;;  %v1130_v50 = vadd.f32 %v411_v6, %v410_v22  ;;  %v571_v5 = vadd.f32 %v569_v63, %v567_v45  ;;  %v754_v13 = vadd.f32 %v752_v1, %v750_v26  ;;  %v544_v14 = vpop.f32.mrf.mxu0 }
 0x10c   :  { %v1132_v15 = vadd.f32 %v233_v12, %v232_v28  ;;  %v1134_v16 = vadd.f32 %v418_v39, %v417_v18  ;;  %v578_v20 = vadd.f32 %v570_v8, %v568_v49  ;;  %v761_v23 = vadd.f32 %v753_v2, %v751_v3 }
 0x10d   :  { %v725_v25 = vpop.f32.mrf.mxu1  ;;  %v1136_v24 = vadd.f32 %v739_v58, %v738_v34  ;;  %v1138_v59 = vadd.f32 %v563_v27, %v562_v53  ;;  %v572_v31 = vrot.slane %v571_v5, 4  ;;  %v755_v32 = vrot.slane %v754_v13, 4  ;;  %v546_v34 = vpop.f32.mrf.mxu0 }
 0x10e   :  { %v558_v22 = vrot.slane %v1123_v7, 1  ;;  %v1141_v33 = vadd.f32 %v746_v62, %v745_v11  ;;  %v579_v37 = vrot.slane %v578_v20, 4  ;;  %v762_v38 = vrot.slane %v761_v23, 4 }
 0x10f   :  { %v727_v21 = vpop.f32.mrf.mxu1  ;;  %v573_v28 = vadd.f32 %v572_v31, %v571_v5  ;;  %v756_v42 = vadd.f32 %v755_v32, %v754_v13  ;;  %v585_v18 = vmul.f32 %v540_v17, %v1037_v41  ;;  %v768_v47 = vmul.f32 %v723_v60, %v1047_v55 }
 0x110   :  { %v580_v51 = vadd.f32 %v579_v37, %v578_v20  ;;  %v763_v53 = vadd.f32 %v762_v38, %v761_v23  ;;  %v586_v6 = vmul.f32 %v542_v9, %v1053_v4  ;;  %v769_v12 = vmul.f32 %v725_v25, %v1056_v10 }
 0x111   :  { %v729_v48 = vpop.f32.mrf.mxu1  ;;  %v574_v11 = vrot.slane %v573_v28, 2  ;;  %v757_v39 = vrot.slane %v756_v42, 2  ;;  %v587_v54 = vmul.f32 %v544_v14, %v1066_v61  ;;  %v770_v57 = vmul.f32 %v727_v21, %v1068_v46 }
 0x112   :  { %v581_v58 = vrot.slane %v580_v51, 2  ;;  %v764_v27 = vrot.slane %v763_v53, 2  ;;  %v588_v41 = vmul.f32 %v546_v34, %v1070_v56  ;;  %v771_v55 = vmul.f32 %v729_v48, %v1072_v0 }
 0x113   :  { %v575_v17 = vadd.f32 %v574_v11, %v573_v28  ;;  %v758_v45 = vadd.f32 %v757_v39, %v756_v42  ;;  %v589_v26 = vadd.f32 %v587_v54, %v585_v18  ;;  %v772_v62 = vadd.f32 %v770_v57, %v768_v47 }
 0x114   :  { %v582_v49 = vadd.f32 %v581_v58, %v580_v51  ;;  %v765_v4 = vadd.f32 %v764_v27, %v763_v53  ;;  %v596_v9 = vadd.f32 %v588_v41, %v586_v6  ;;  %v779_v10 = vadd.f32 %v771_v55, %v769_v12 }
 0x115   :  { %v741_v63 = vrot.slane %v1136_v24, 1  ;;  %v576_v1 = vrot.slane %v575_v17, 1  ;;  %v590_v61 = vrot.slane %v589_v26, 4  ;;  %v773_v60 = vrot.slane %v772_v62, 4 }
 0x116   :  { %v565_v46 = vrot.slane %v1138_v59, 1  ;;  %v759_v3 = vrot.slane %v758_v45, 1  ;;  %v597_v8 = vrot.slane %v596_v9, 4  ;;  %v780_v56 = vrot.slane %v779_v10, 4 }
 0x117   :  { %v748_v0 = vrot.slane %v1141_v33, 1  ;;  %v583_v2 = vrot.slane %v582_v49, 1  ;;  %v591_v5 = vadd.f32 %v590_v61, %v589_v26  ;;  %v774_v13 = vadd.f32 %v773_v60, %v772_v62 }
 0x118   :  { %v559_v25 = vadd.f32 %v558_v22, %v1123_v7  ;;  %v766_v14 = vrot.slane %v765_v4, 1  ;;  %v598_v20 = vadd.f32 %v597_v8, %v596_v9  ;;  %v781_v23 = vadd.f32 %v780_v56, %v779_v10 }
 0x119   :  { %v577_v31 = vadd.f32 %v576_v1, %v575_v17  ;;  %v592_v32 = vrot.slane %v591_v5, 2  ;;  %v775_v21 = vrot.slane %v774_v13, 2  ;;  %v236_v37 = vsel %vm235_vm1, %v1088_v29, %v1109_v30 }
 0x11a   :  { %v760_v38 = vadd.f32 %v759_v3, %v758_v45  ;;  %v599_v28 = vrot.slane %v598_v20, 2  ;;  %v782_v42 = vrot.slane %v781_v23, 2  ;;  %v239_v18 = vsel %vm238_vm2, %v236_v37, %v1128_v44 }
 0x11b   :  { %v584_v47 = vadd.f32 %v583_v2, %v582_v49  ;;  %v593_v34 = vadd.f32 %v592_v32, %v591_v5  ;;  %v776_v48 = vadd.f32 %v775_v21, %v774_v13  ;;  %v420_v7 = vsel %vm235_vm1, %v1092_v36, %v1111_v40 }
 0x11c   :  { %v600_v22 = vadd.f32 %v599_v28, %v598_v20  ;;  %v783_v51 = vadd.f32 %v782_v42, %v781_v23  ;;  %v237_v53 = vsel %vm235_vm1, %v1090_v19, %v1114_v43  ;;  %v422_v29 = vsel %vm238_vm2, %v420_v7, %v1130_v50 }
 0x11d   :  { %v594_v30 = vrot.slane %v593_v34, 1  ;;  %v777_v6 = vrot.slane %v776_v48, 1  ;;  %v421_v44 = vsel %vm235_vm1, %v1106_v35, %v1116_v52  ;;  %v424_v12 = vadd.f32 %v422_v29, %v239_v18 }
 0x11e   :  { %v601_v11 = vrot.slane %v600_v22, 1  ;;  %v784_v39 = vrot.slane %v783_v51, 1  ;;  %v240_v36 = vsel %vm238_vm2, %v237_v53, %v1132_v15  ;;  %v423_v40 = vsel %vm238_vm2, %v421_v44, %v1134_v16 }
 0x11f   :  { %v566_v19 = vadd.f32 %v565_v46, %v1138_v59  ;;  %v767_v43 = vadd.f32 %v766_v14, %v765_v4  ;;  %v595_v54 = vadd.f32 %v594_v30, %v593_v34  ;;  %v778_v50 = vadd.f32 %v777_v6, %v776_v48 }
 0x120   :  { %v742_v57 = vadd.f32 %v741_v63, %v1136_v24  ;;  %v602_v58 = vadd.f32 %v601_v11, %v600_v22  ;;  %v785_v27 = vadd.f32 %v784_v39, %v783_v51  ;;  %v603_v35 = vsel %vm235_vm1, %v559_v25, %v577_v31 }
 0x121   :  { %v749_v52 = vadd.f32 %v748_v0, %v1141_v33  ;;  %v425_v41 = vadd.f32 %v423_v40, %v240_v36  ;;  %v604_v55 = vsel %vm235_vm1, %v566_v19, %v584_v47  ;;  %v605_v15 = vsel %vm238_vm2, %v603_v35, %v595_v54 }
 0x122   :  { %v606_v16 = vsel %vm238_vm2, %v604_v55, %v602_v58  ;;  %v607_v17 = vadd.f32 %v605_v15, %v424_v12  ;;  %v786_v59 = vsel %vm235_vm1, %v742_v57, %v760_v38 }
 0x123   :  { %v608_v45 = vadd.f32 %v606_v16, %v425_v41  ;;  %v787_v26 = vsel %vm235_vm1, %v749_v52, %v767_v43  ;;  %v788_v24 = vsel %vm238_vm2, %v786_v59, %v778_v50 }
 0x124   :  { %v789_v62 = vsel %vm238_vm2, %v787_v26, %v785_v27  ;;  %v790_v49 = vadd.f32 %v788_v24, %v607_v17 }
 0x125   :  { %v791_v4 = vadd.f32 %v789_v62, %v608_v45 }
 0x126   :  { %v792_v33 = vmul.f32 0.25, %v790_v49 }
 0x127   :  { %v793_v9 = vmul.f32 0.25, %v791_v4 }
 0x129   :  { %v796_v10 = vcombine.low %v792_v33, %v793_v9 }
 0x12b   :  { %798 = vst [vmem:[#allocation2] sm:$0x77] %v796_v10 }
 0x12c   :  { %838 = shalt.err (!%p835_p4)
}
 0x12d   :  { %808 = dma.vmem_to_hbm [thread:$0]  %s806_s30, 128, %s1192_s3, [#allocation3]  }
 0x12e   :  { %847 = dma.done.wait [#allocation3], 128  }
 0x12f   :  { %848 = vsyncadd [#allocation3], 4294967168 }
 0x130   :  { %812 = vsyncpa [#allocation3], 1 }

</bundles_post_ra>
